<compile_context>
chip_gen: v7x
topology: tpu7x:2x2x1
jax: 0.10.0
libtpu: 0.0.40
codegen_flags: <defaults>
</compile_context>

<pallas_src>
import numpy as np
import jax
import jax.numpy as jnp
from jax.experimental import pallas as pl
from jax.experimental.pallas import tpu as pltpu


def cnot_permutation_np(c, t, d, n):
    """Static permutation vectors for the CNOT qudit gate (numpy, trace time).

    Returns (lin, inv), both int arrays of shape (D,), D = d**n, where
    U[lin[i], i] = 1 (matching torch CNOT_sparse) and therefore
    forward(x) = U @ x == x[inv] row-wise, with inv the inverse of lin.
    """
    D = d ** n
    idx = np.arange(D)
    powers = d ** np.arange(n - 1, -1, -1)            # most-significant qudit first
    digits = (idx[:, None] // powers[None, :]) % d    # (D, n)
    new_t = (digits[:, t] + digits[:, c]) % d         # target digit after CNOT
    lin = idx + (new_t - digits[:, t]) * powers[t]    # row index of the 1 in column i
    inv = np.empty(D, dtype=np.int64)
    inv[lin] = idx                                    # inverse permutation
    return lin, inv


def _make_cnot_kernel(inv_perm):
    """Kernel with the inverse permutation baked in as static row slices."""
    inv = tuple(int(s) for s in inv_perm)

    def kernel(xr_ref, xi_ref, yr_ref, yi_ref):
        # xr/xi: (D, B) f32 in VMEM, B on the lane axis (lane-dense).
        xr = xr_ref[...]                                   # one whole-tile load
        xi = xi_ref[...]
        # Static row shuffle assembled in-register (sublane shuffles / XLU),
        # then a single unmasked full-tile store per plane.
        yr_ref[...] = jnp.concatenate([xr[s:s + 1, :] for s in inv], axis=0)
        yi_ref[...] = jnp.concatenate([xi[s:s + 1, :] for s in inv], axis=0)

    return kernel


def make_cnot_apply(c, t, d, n):
    """Build y_real, y_imag = U @ (x_real + i*x_imag) as a static row gather."""
    _, inv_perm = cnot_permutation_np(c, t, d, n)
    kernel = _make_cnot_kernel(inv_perm)
    D = d ** n

    @jax.jit
    def apply(x_real, x_imag):
        assert x_real.shape[0] == D and x_real.shape == x_imag.shape
        B = x_real.shape[1]
        return pl.pallas_call(
            kernel,
            out_shape=(jax.ShapeDtypeStruct((D, B), x_real.dtype),
                       jax.ShapeDtypeStruct((D, B), x_imag.dtype)),
            in_specs=[pl.BlockSpec(memory_space=pltpu.MemorySpace.VMEM),
                      pl.BlockSpec(memory_space=pltpu.MemorySpace.VMEM)],
            out_specs=(pl.BlockSpec(memory_space=pltpu.MemorySpace.VMEM),
                       pl.BlockSpec(memory_space=pltpu.MemorySpace.VMEM)),
        )(x_real, x_imag)

    return apply


if __name__ == "__main__":
    # Module config: CNOT(index=(0, 1), dim=3, N=2)  ->  D = 3**2 = 9
    dim, N = 3, 2
    c, t = 0, 1
    D = dim ** N
    B = 128  # batch of state columns on the lane axis (lane-dense stores)

    key = jax.random.PRNGKey(0)
    kr, ki = jax.random.split(key)
    x_real = jax.random.normal(kr, (D, B), dtype=jnp.float32)
    x_imag = jax.random.normal(ki, (D, B), dtype=jnp.float32)

    cnot = make_cnot_apply(c, t, dim, N)
    y_real, y_imag = jax.block_until_ready(cnot(x_real, x_imag))

    # Reference check: dense complex permutation matmul (same as the torch module).
    lin, _ = cnot_permutation_np(c, t, dim, N)
    U = np.zeros((D, D), dtype=np.complex64)
    U[lin, np.arange(D)] = 1.0
    x_c = np.asarray(x_real) + 1j * np.asarray(x_imag)
    y_ref = U @ x_c
    y = np.asarray(y_real) + 1j * np.asarray(y_imag)
    assert np.allclose(y, y_ref, atol=1e-5), "mismatch vs reference"

    print("KERNEL_OK")
</pallas_src>

<mosaic_0001>
module attributes {stable_mosaic.version = 11 : i64} {
  func.func @kernel(%arg0: memref<9x128xf32, #tpu.memory_space<vmem>>, %arg1: memref<9x128xf32, #tpu.memory_space<vmem>>, %arg2: memref<9x128xf32, #tpu.memory_space<vmem>>, %arg3: memref<9x128xf32, #tpu.memory_space<vmem>>) attributes {dimension_semantics = [], scalar_prefetch = 0 : i64, scratch_operands = 0 : i64, tpu.core_type = #tpu.core_type<tc>} {
    %c0 = arith.constant 0 : index
    %c0_0 = arith.constant 0 : index
    %0 = vector.load %arg0[%c0, %c0_0] : memref<9x128xf32, #tpu.memory_space<vmem>>, vector<9x128xf32>
    %c0_1 = arith.constant 0 : index
    %c0_2 = arith.constant 0 : index
    %1 = vector.load %arg1[%c0_1, %c0_2] : memref<9x128xf32, #tpu.memory_space<vmem>>, vector<9x128xf32>
    %2 = vector.extract_strided_slice %0 {offsets = [0, 0], sizes = [1, 128], strides = [1, 1]} : vector<9x128xf32> to vector<1x128xf32>
    %3 = vector.extract_strided_slice %0 {offsets = [1, 0], sizes = [1, 128], strides = [1, 1]} : vector<9x128xf32> to vector<1x128xf32>
    %4 = vector.extract_strided_slice %0 {offsets = [2, 0], sizes = [1, 128], strides = [1, 1]} : vector<9x128xf32> to vector<1x128xf32>
    %5 = vector.extract_strided_slice %0 {offsets = [5, 0], sizes = [1, 128], strides = [1, 1]} : vector<9x128xf32> to vector<1x128xf32>
    %6 = vector.extract_strided_slice %0 {offsets = [3, 0], sizes = [1, 128], strides = [1, 1]} : vector<9x128xf32> to vector<1x128xf32>
    %7 = vector.extract_strided_slice %0 {offsets = [4, 0], sizes = [1, 128], strides = [1, 1]} : vector<9x128xf32> to vector<1x128xf32>
    %8 = vector.extract_strided_slice %0 {offsets = [7, 0], sizes = [1, 128], strides = [1, 1]} : vector<9x128xf32> to vector<1x128xf32>
    %9 = vector.extract_strided_slice %0 {offsets = [8, 0], sizes = [1, 128], strides = [1, 1]} : vector<9x128xf32> to vector<1x128xf32>
    %10 = vector.extract_strided_slice %0 {offsets = [6, 0], sizes = [1, 128], strides = [1, 1]} : vector<9x128xf32> to vector<1x128xf32>
    %11 = tpu.concatenate %2, %3, %4, %5, %6, %7, %8, %9, %10 in 0 : vector<1x128xf32>, vector<1x128xf32>, vector<1x128xf32>, vector<1x128xf32>, vector<1x128xf32>, vector<1x128xf32>, vector<1x128xf32>, vector<1x128xf32>, vector<1x128xf32> -> vector<9x128xf32>
    %c0_3 = arith.constant 0 : index
    %c0_4 = arith.constant 0 : index
    %12 = vector.load %arg2[%c0_3, %c0_4] : memref<9x128xf32, #tpu.memory_space<vmem>>, vector<9x128xf32>
    tpu.vector_store %arg2[%c0_3, %c0_4], %11 {strides = array<i32>} : memref<9x128xf32, #tpu.memory_space<vmem>>, vector<9x128xf32>,
    %13 = vector.extract_strided_slice %1 {offsets = [0, 0], sizes = [1, 128], strides = [1, 1]} : vector<9x128xf32> to vector<1x128xf32>
    %14 = vector.extract_strided_slice %1 {offsets = [1, 0], sizes = [1, 128], strides = [1, 1]} : vector<9x128xf32> to vector<1x128xf32>
    %15 = vector.extract_strided_slice %1 {offsets = [2, 0], sizes = [1, 128], strides = [1, 1]} : vector<9x128xf32> to vector<1x128xf32>
    %16 = vector.extract_strided_slice %1 {offsets = [5, 0], sizes = [1, 128], strides = [1, 1]} : vector<9x128xf32> to vector<1x128xf32>
    %17 = vector.extract_strided_slice %1 {offsets = [3, 0], sizes = [1, 128], strides = [1, 1]} : vector<9x128xf32> to vector<1x128xf32>
    %18 = vector.extract_strided_slice %1 {offsets = [4, 0], sizes = [1, 128], strides = [1, 1]} : vector<9x128xf32> to vector<1x128xf32>
    %19 = vector.extract_strided_slice %1 {offsets = [7, 0], sizes = [1, 128], strides = [1, 1]} : vector<9x128xf32> to vector<1x128xf32>
    %20 = vector.extract_strided_slice %1 {offsets = [8, 0], sizes = [1, 128], strides = [1, 1]} : vector<9x128xf32> to vector<1x128xf32>
    %21 = vector.extract_strided_slice %1 {offsets = [6, 0], sizes = [1, 128], strides = [1, 1]} : vector<9x128xf32> to vector<1x128xf32>
    %22 = tpu.concatenate %13, %14, %15, %16, %17, %18, %19, %20, %21 in 0 : vector<1x128xf32>, vector<1x128xf32>, vector<1x128xf32>, vector<1x128xf32>, vector<1x128xf32>, vector<1x128xf32>, vector<1x128xf32>, vector<1x128xf32>, vector<1x128xf32> -> vector<9x128xf32>
    %c0_5 = arith.constant 0 : index
    %c0_6 = arith.constant 0 : index
    %23 = vector.load %arg3[%c0_5, %c0_6] : memref<9x128xf32, #tpu.memory_space<vmem>>, vector<9x128xf32>
    tpu.vector_store %arg3[%c0_5, %c0_6], %22 {strides = array<i32>} : memref<9x128xf32, #tpu.memory_space<vmem>>, vector<9x128xf32>,
    return
  }
}

</mosaic_0001>

<bundles_post_ra>
// kernel: apply.1
= control target key start
LH: loop header
LB: loop body
LE: loop exit
PB: predicated region body
PF: predicated region fallthrough
CT: control target
= control target key end

     0   :  { %9 = vsyncpa [#allocation3], 0  ;;  %s329_s0 = inlined_call_operand.hbm [shape: f32[9,128], index: 0, kind: input, shape index: {}]   ;;  %s330_s1 = inlined_call_operand.hbm [shape: f32[9,128], index: 1, kind: input, shape index: {}]   ;;  %s331_s2 = inlined_call_operand.hbm [shape: f32[9,128], index: 2, kind: output, shape index: {0}]   ;;  %s332_s3 = inlined_call_operand.hbm [shape: f32[9,128], index: 3, kind: output, shape index: {1}]  }
   0x1   :  { %10 = vsyncpa [#allocation6], 0 }
   0x2   :  { %11 = vsyncpa [#allocation4], 0 }
   0x3   :  { %12 = vsyncpa [#allocation9], 0  ;;  %s226_s12 = smov [#allocation2]   ;;  %s130_s16 = scalar_lea.hbm %s329_s0, 256 }
   0x4   :  { %s18_s13 = sshll.u32 %s226_s12, 4  ;;  %p131_p0 = scmp.ne.s32.totalorder %s329_s0, %s130_s16  ;;  %s19_s13 = int_to_ptr.vmem [resolvable:$true] %s18_s13 }
   0x5   :  { %p134_p1 = scmp.lt.u32.totalorder %s130_s16, %s329_s0 }
   0x7   :  { %p136_p2 = pnand %p134_p1, %p131_p0 }
   0x9   :  { %139 = shalt.err (!%p136_p2)
}
   0xa   :  { %s140_s21 = scalar_lea.vmem %s19_s13, 256  ;;  %p145_p4 = scmp.lt.s32.totalorder %s19_s13, %s19_s13 }
   0xb   :  { %p141_p3 = scmp.ne.s32.totalorder %s19_s13, %s140_s21  ;;  %p146_p5 = scmp.lt.s32.totalorder %s140_s21, %s140_s21 }
   0xd   :  { %p147_p6 = por %p146_p5, %p145_p4 }
   0xf   :  { %p148_p7 = pnand %p147_p6, %p141_p3 }
  0x11   :  { %151 = shalt.err (!%p148_p7)
}
  0x12   :  { %s227_s22 = smov 128   ;;  %s228_s23 = smov 8  }
  0x13   :  { %24 = dma.hbm_to_vmem [thread:$0]  %s329_s0, 256, %s19_s13, [#allocation3], %s227_s22, %s227_s22, %s228_s23  }
  0x14   :  { %s229_s26 = smov [#allocation5]   ;;  %s152_s30 = scalar_lea.hbm %s330_s1, 256 }
  0x15   :  { %s30_s27 = sshll.u32 %s229_s26, 4  ;;  %p153_p8 = scmp.ne.s32.totalorder %s330_s1, %s152_s30  ;;  %s31_s27 = int_to_ptr.vmem [resolvable:$true] %s30_s27 }
  0x16   :  { %p156_p9 = scmp.lt.u32.totalorder %s152_s30, %s330_s1 }
  0x18   :  { %p158_p10 = pnand %p156_p9, %p153_p8 }
  0x1a   :  { %161 = shalt.err (!%p158_p10)
}
  0x1b   :  { %s162_s8 = scalar_lea.vmem %s31_s27, 256  ;;  %p167_p12 = scmp.lt.s32.totalorder %s31_s27, %s31_s27 }
  0x1c   :  { %p163_p11 = scmp.ne.s32.totalorder %s31_s27, %s162_s8  ;;  %p168_p13 = scmp.lt.s32.totalorder %s162_s8, %s162_s8 }
  0x1e   :  { %p169_p0 = por %p168_p13, %p167_p12 }
  0x20   :  { %p170_p1 = pnand %p169_p0, %p163_p11 }
  0x22   :  { %173 = shalt.err (!%p170_p1)
}
  0x23   :  { %36 = dma.hbm_to_vmem [thread:$0]  %s330_s1, 256, %s31_s27, [#allocation6], %s227_s22, %s227_s22, %s228_s23  }
  0x24   :  { %218 = dma.done.wait [#allocation3], 256  }
  0x25   :  { %219 = vsyncadd [#allocation3], 4294967040 }
  0x26   :  { %220 = dma.done.wait [#allocation6], 256  }
  0x27   :  { %221 = vsyncadd [#allocation6], 4294967040  ;;  %vm59_vm0 = vcmask 1042432   ;;  %vm61_vm1 = vcmask 1043456   ;;  %v43_v0 = vld [vmem:[#allocation2] sm:$0xff]  ;;  %vm63_vm2 = vcmask 1044480  }
  0x28   :  { %v44_v1 = vld [vmem:[#allocation2 + $0x8] sm:$0x1]  ;;  %v45_v2 = vld [vmem:[#allocation5] sm:$0xff]  ;;  %v48_v3 = vrot.slane %v43_v0, 2  ;;  %v50_v4 = vrot.slane %v43_v0, 7  ;;  %vm65_vm3 = vcmask 1045504  }
  0x29   :  { %v46_v5 = vld [vmem:[#allocation5 + $0x8] sm:$0x1]  ;;  %v52_v6 = vrot.slane %v43_v0, 1  ;;  %v57_v7 = vrot.slane %v43_v0, 6  ;;  %v72_v8 = vrot.slane %v45_v2, 2  ;;  %v74_v9 = vrot.slane %v45_v2, 7 }
  0x2a   :  { %v55_v10 = vrot.slane %v44_v1, 1  ;;  %v60_v11 = vsel %vm59_vm0, %v43_v0, %v48_v3  ;;  %v76_v12 = vrot.slane %v45_v2, 1  ;;  %v81_v13 = vrot.slane %v45_v2, 6  ;;  %s230_s1 = smov [#allocation7]   ;;  %s231_s11 = smov [#allocation8]  }
  0x2b   :  { %s95_s10 = sshll.u32 %s230_s1, 4  ;;  %v62_v14 = vsel %vm61_vm1, %v60_v11, %v50_v4  ;;  %vm67_vm4 = vcmask 1046528   ;;  %70 = vst [vmem:[#allocation7 + $0x8] sm:$0x1] %v57_v7  ;;  %v79_v15 = vrot.slane %v46_v5, 1  ;;  %v83_v16 = vsel %vm59_vm0, %v45_v2, %v72_v8  ;;  %s107_s12 = sshll.u32 %s231_s11, 4  ;;  %s96_s10 = int_to_ptr.vmem [resolvable:$true] %s95_s10  ;;  %s291_s12 = int_to_ptr.vmem [resolvable:$true] %s107_s12 }
  0x2c   :  { %v64_v17 = vsel %vm63_vm2, %v62_v14, %v50_v4  ;;  %v84_v18 = vsel %vm61_vm1, %v83_v16, %v74_v9  ;;  %89 = vst [vmem:[#allocation8 + $0x8] sm:$0x1] %v81_v13  ;;  %s174_s13 = scalar_lea.vmem %s96_s10, 256  ;;  %p179_p3 = scmp.lt.s32.totalorder %s96_s10, %s96_s10 }
  0x2d   :  { %v66_v19 = vsel %vm65_vm3, %v64_v17, %v52_v6  ;;  %v85_v20 = vsel %vm63_vm2, %v84_v18, %v74_v9  ;;  %p175_p2 = scmp.ne.s32.totalorder %s96_s10, %s174_s13  ;;  %p180_p4 = scmp.lt.s32.totalorder %s174_s13, %s174_s13 }
  0x2e   :  { %v68_v21 = vsel %vm67_vm4, %v66_v19, %v55_v10  ;;  %v86_v22 = vsel %vm65_vm3, %v85_v20, %v76_v12 }
  0x2f   :  { %69 = vst [vmem:[#allocation7] sm:$0xff] %v68_v21  ;;  %v87_v23 = vsel %vm67_vm4, %v86_v22, %v79_v15  ;;  %p181_p5 = por %p180_p4, %p179_p3 }
  0x30   :  { %88 = vst [vmem:[#allocation8] sm:$0xff] %v87_v23 }
  0x31   :  { %p182_p6 = pnand %p181_p5, %p175_p2 }
  0x33   :  { %185 = shalt.err (!%p182_p6)
}
  0x34   :  { %s186_s16 = scalar_lea.hbm %s331_s2, 256 }
  0x35   :  { %p187_p7 = scmp.ne.s32.totalorder %s331_s2, %s186_s16  ;;  %p190_p8 = scmp.lt.u32.totalorder %s186_s16, %s331_s2 }
  0x37   :  { %p192_p9 = pnand %p190_p8, %p187_p7 }
  0x39   :  { %195 = shalt.err (!%p192_p9)
}
  0x3a   :  { %101 = dma.vmem_to_hbm [thread:$0]  %s96_s10, 256, %s331_s2, [#allocation4], %s227_s22, %s227_s22, %s228_s23  }
  0x3b   :  { %s196_s25 = scalar_lea.vmem %s291_s12, 256  ;;  %p201_p11 = scmp.lt.s32.totalorder %s291_s12, %s291_s12 }
  0x3c   :  { %p197_p10 = scmp.ne.s32.totalorder %s291_s12, %s196_s25  ;;  %p202_p12 = scmp.lt.s32.totalorder %s196_s25, %s196_s25 }
  0x3e   :  { %p203_p13 = por %p202_p12, %p201_p11 }
  0x40   :  { %p204_p0 = pnand %p203_p13, %p197_p10 }
  0x42   :  { %207 = shalt.err (!%p204_p0)
}
  0x43   :  { %s208_s28 = scalar_lea.hbm %s332_s3, 256 }
  0x44   :  { %p209_p1 = scmp.ne.s32.totalorder %s332_s3, %s208_s28  ;;  %p212_p2 = scmp.lt.u32.totalorder %s208_s28, %s332_s3 }
  0x46   :  { %p214_p3 = pnand %p212_p2, %p209_p1 }
  0x48   :  { %217 = shalt.err (!%p214_p3)
}
  0x49   :  { %113 = dma.vmem_to_hbm [thread:$0]  %s291_s12, 256, %s332_s3, [#allocation9], %s227_s22, %s227_s22, %s228_s23  }
  0x4a   :  { %222 = dma.done.wait [#allocation4], 256  }
  0x4b   :  { %223 = vsyncadd [#allocation4], 4294967040 }
  0x4c   :  { %224 = dma.done.wait [#allocation9], 256  }
  0x4d   :  { %225 = vsyncadd [#allocation9], 4294967040 }
  0x4e   :  { %120 = vsyncpa [#allocation3], 1 }
  0x4f   :  { %121 = vsyncpa [#allocation6], 1 }
  0x50   :  { %122 = vsyncpa [#allocation4], 1 }
  0x51   :  { %123 = vsyncpa [#allocation9], 1 }

</bundles_post_ra>
